<compile_context>
chip_gen: v7x
topology: tpu7x:2x2x1
jax: 0.10.0
libtpu: 0.0.40
codegen_flags: <defaults>
</compile_context>

<pallas_src>
import functools

import jax
import jax.numpy as jnp
import numpy as np
from jax.experimental import pallas as pl
from jax.experimental.pallas import tpu as pltpu

NEG_SLOPE = 0.01  # PyTorch LeakyReLU default


def _leaky(x):
    return jnp.where(x > 0, x, NEG_SLOPE * x)


# --------------------------------------------------------------------------- #
# Pallas kernel: per-point MLP (6 -> 64 -> 128 -> H) + running max pool
# --------------------------------------------------------------------------- #
def pointfeat_kernel(
    x_ref,                       # (1, 6, TN)  NCL point tile (lane-dense)
    w1_ref, b1_ref,              # (64, 6)  bf16, (64, 1)  f32   conv1 (BN folded)
    w2_ref, b2_ref,              # (128, 64) bf16, (128, 1) f32  conv2 (BN folded)
    w3_ref, b3_ref,              # (H, 128) bf16, (H, 1)   f32   conv3
    pooled_ref,                  # (1, 1, H, 1) f32  per-(batch, split) pooled features
    maxacc,                      # scratch VMEM (H, 128) f32 -- lane-partial running max
):
    # NOTE: the reduction axis (point tiles, grid axis 2) MUST stay innermost and
    # "arbitrary"; maxacc would mix (batch, split) programs otherwise.
    t = pl.program_id(2)

    @pl.when(t == 0)
    def _init():
        maxacc[...] = jnp.full(maxacc.shape, -jnp.inf, dtype=maxacc.dtype)

    # (6, TN) point tile; cast to bf16 only for the MXU operands.
    x = x_ref[0].astype(jnp.bfloat16)

    # Per-point MLP as channel-major matmuls: bf16 MXU inputs, f32 accumulate,
    # f32 VPU element-wise (bias add + LeakyReLU).
    h = jnp.dot(w1_ref[...], x, preferred_element_type=jnp.float32) + b1_ref[...]
    h = _leaky(h)
    h = jnp.dot(w2_ref[...], h.astype(jnp.bfloat16),
                preferred_element_type=jnp.float32) + b2_ref[...]
    h = _leaky(h)
    h = jnp.dot(w3_ref[...], h.astype(jnp.bfloat16),
                preferred_element_type=jnp.float32) + b3_ref[...]     # (H, TN) f32

    # AdaptiveMaxPool1d(1): keep 128 lane-partials and update them with pure
    # element-wise maximums (VPU only); the cross-lane reduce happens once below.
    m = maxacc[...]
    tn = h.shape[1]
    for k in range(tn // 128):                      # static, lane-aligned slices
        m = jnp.maximum(m, h[:, k * 128:(k + 1) * 128])
    maxacc[...] = m

    @pl.when(t == pl.num_programs(2) - 1)
    def _finalize():
        pooled = jnp.max(maxacc[...], axis=1, keepdims=True)          # (H, 1)
        pooled_ref[...] = pooled.reshape(pooled_ref.shape)


# --------------------------------------------------------------------------- #
# Wrapper
# --------------------------------------------------------------------------- #
def pointnet_forward(x_ncl, packed, *, tile_n=512, num_splits=None):
    """x_ncl: (B, 6, N) points in the module's native NCL layout.
    packed : dict from fold_and_pack().  Returns (B, 9) float32."""
    B, C, N = x_ncl.shape
    assert C == 6
    assert tile_n % 128 == 0, "tile_n must be a multiple of 128 (lane width)"
    H = packed["w3"].shape[0]

    if num_splits is None:
        # Keep both v7x TensorCores busy even for a single point cloud.
        num_splits = 2 if B == 1 else 1

    chunk = num_splits * tile_n
    if N % chunk:
        # Duplicated edge points never change a max-pool -> padding is exact.
        pad = chunk - (N % chunk)
        x_ncl = jnp.pad(x_ncl, ((0, 0), (0, 0), (0, pad)), mode="edge")
        N += pad
    tiles_per_split = N // chunk

    w1, b1 = packed["w1"], packed["b1"]
    w2, b2 = packed["w2"], packed["b2"]
    w3, b3 = packed["w3"], packed["b3"]

    def _const(a):
        nd = a.ndim
        return pl.BlockSpec(a.shape, lambda b, p, t: (0,) * nd)

    pooled_parts = pl.pallas_call(
        pointfeat_kernel,
        out_shape=jax.ShapeDtypeStruct((B, num_splits, H, 1), jnp.float32),
        grid_spec=pltpu.PrefetchScalarGridSpec(
            num_scalar_prefetch=0,
            grid=(B, num_splits, tiles_per_split),
            in_specs=[
                pl.BlockSpec((1, 6, tile_n),
                             lambda b, p, t: (b, 0, p * tiles_per_split + t)),
                _const(w1), _const(b1),
                _const(w2), _const(b2),
                _const(w3), _const(b3),
            ],
            out_specs=pl.BlockSpec((1, 1, H, 1), lambda b, p, t: (b, p, 0, 0)),
            scratch_shapes=[pltpu.VMEM((H, 128), jnp.float32)],
        ),
        compiler_params=pltpu.CompilerParams(
            dimension_semantics=("parallel", "parallel", "arbitrary")),
    )(x_ncl, w1, b1, w2, b2, w3, b3)

    # Combine the per-split partial maxes -> (B, H) pooled features.
    pooled = jnp.max(pooled_parts[..., 0], axis=1)

    # Head MLP hoisted out of the point loop: one batched chain (M = B on MXU).
    g = _leaky(pooled @ packed["lw1"] + packed["lb1"])
    g = _leaky(g @ packed["lw2"] + packed["lb2"])
    return g @ packed["lw3"] + packed["lb3"]


# --------------------------------------------------------------------------- #
# Parameters: raw (PyTorch-style) + BN-folded / packed-for-kernel
# --------------------------------------------------------------------------- #
def init_params(key, hidden_size):
    """Raw parameters in PyTorch layout: conv/linear weights are (Cout, Cin)."""
    ks = jax.random.split(key, 8)

    def layer(k, cout, cin):
        kw, kb = jax.random.split(k)
        bound = 1.0 / np.sqrt(cin)
        w = jax.random.uniform(kw, (cout, cin), jnp.float32, -bound, bound)
        b = jax.random.uniform(kb, (cout,), jnp.float32, -bound, bound)
        return w, b

    def bn_stats(k, c):
        k1, k2, k3, k4 = jax.random.split(k, 4)
        gamma = 1.0 + 0.1 * jax.random.normal(k1, (c,), jnp.float32)
        beta = 0.05 * jax.random.normal(k2, (c,), jnp.float32)
        mean = 0.1 * jax.random.normal(k3, (c,), jnp.float32)
        var = 1.0 + 0.2 * jax.random.uniform(k4, (c,), jnp.float32)
        return gamma, beta, mean, var

    w1, b1 = layer(ks[0], 64, 6)
    w2, b2 = layer(ks[1], 128, 64)
    w3, b3 = layer(ks[2], hidden_size, 128)
    lw1, lb1 = layer(ks[5], 256, hidden_size)
    lw2, lb2 = layer(ks[6], 128, 256)
    lw3, lb3 = layer(ks[7], 9, 128)
    return dict(w1=w1, b1=b1, bn1=bn_stats(ks[3], 64),
                w2=w2, b2=b2, bn2=bn_stats(ks[4], 128),
                w3=w3, b3=b3,
                lw1=lw1, lb1=lb1, lw2=lw2, lb2=lb2, lw3=lw3, lb3=lb3)


def fold_and_pack(p, eps=1e-5, matmul_dtype=jnp.bfloat16):
    """Fold eval-mode BatchNorm1d (running stats) into conv1/conv2 and pack
    weights in the layout the kernel expects (bf16 MXU weights, f32 biases)."""
    def fold(w, b, bn):
        gamma, beta, mean, var = bn
        s = gamma / jnp.sqrt(var + eps)
        return w * s[:, None], s * b + beta - s * mean

    w1f, b1f = fold(p["w1"], p["b1"], p["bn1"])
    w2f, b2f = fold(p["w2"], p["b2"], p["bn2"])
    return dict(
        w1=w1f.astype(matmul_dtype), b1=b1f.reshape(-1, 1).astype(jnp.float32),
        w2=w2f.astype(matmul_dtype), b2=b2f.reshape(-1, 1).astype(jnp.float32),
        w3=p["w3"].astype(matmul_dtype), b3=p["b3"].reshape(-1, 1).astype(jnp.float32),
        lw1=p["lw1"].T, lb1=p["lb1"],
        lw2=p["lw2"].T, lb2=p["lb2"],
        lw3=p["lw3"].T, lb3=p["lb3"],
    )


# --------------------------------------------------------------------------- #
# Pure-JAX reference of the original (unfolded, f32) module forward pass
# --------------------------------------------------------------------------- #
def pointnet_reference(x_ncl, p, eps=1e-5):
    def conv(x, w, b):                                    # 1x1 Conv1d
        return jnp.einsum("oc,bcn->bon", w, x) + b[None, :, None]

    def bn(x, stats):
        gamma, beta, mean, var = stats
        return (gamma[None, :, None] * (x - mean[None, :, None])
                / jnp.sqrt(var[None, :, None] + eps) + beta[None, :, None])

    h = _leaky(bn(conv(x_ncl, p["w1"], p["b1"]), p["bn1"]))
    h = _leaky(bn(conv(h, p["w2"], p["b2"]), p["bn2"]))
    h = conv(h, p["w3"], p["b3"])
    f = jnp.max(h, axis=2)                                # AdaptiveMaxPool1d(1) + squeeze
    g = _leaky(f @ p["lw1"].T + p["lb1"])
    g = _leaky(g @ p["lw2"].T + p["lb2"])
    return g @ p["lw3"].T + p["lb3"]                      # (B, 9)


# --------------------------------------------------------------------------- #
if __name__ == "__main__":
    key = jax.random.PRNGKey(0)
    k_x, k_p = jax.random.split(key)

    B, N, HIDDEN = 2, 1024, 128                           # small synthetic sizes
    # module input: (B, 2, 3, N) -> view(B, 6, N)
    x4 = jax.random.normal(k_x, (B, 2, 3, N), jnp.float32)
    x = x4.reshape(B, 6, N)

    raw = init_params(k_p, HIDDEN)
    packed = fold_and_pack(raw)

    fwd = jax.jit(functools.partial(pointnet_forward, tile_n=256, num_splits=2))
    out = jax.block_until_ready(fwd(x, packed))

    ref = pointnet_reference(x, raw)
    # bf16 MXU operands with f32 accumulation -> loose tolerance vs f32 reference
    np.testing.assert_allclose(np.asarray(out), np.asarray(ref), rtol=2e-2, atol=2e-2)

    assert out.shape == (B, 9)
    print("KERNEL_OK")
</pallas_src>

<mosaic_0001>
module attributes {stable_mosaic.version = 11 : i64} {
  func.func @pointfeat_kernel(%arg0: i32, %arg1: i32, %arg2: i32, %arg3: memref<1x6x256xf32, #tpu.memory_space<vmem>>, %arg4: memref<64x6xbf16, #tpu.memory_space<vmem>>, %arg5: memref<64x1xf32, #tpu.memory_space<vmem>>, %arg6: memref<128x64xbf16, #tpu.memory_space<vmem>>, %arg7: memref<128x1xf32, #tpu.memory_space<vmem>>, %arg8: memref<128x128xbf16, #tpu.memory_space<vmem>>, %arg9: memref<128x1xf32, #tpu.memory_space<vmem>>, %arg10: memref<1x1x128x1xf32, #tpu.memory_space<vmem>>, %arg11: memref<128x128xf32, #tpu.memory_space<vmem>>) attributes {dimension_semantics = [#tpu.dimension_semantics<parallel>, #tpu.dimension_semantics<parallel>, #tpu.dimension_semantics<arbitrary>], iteration_bounds = array<i64: 2, 2, 2>, scalar_prefetch = 0 : i64, scratch_operands = 1 : i64, tpu.core_type = #tpu.core_type<tc>, window_params = [{transform_indices = @transform_0, window_bounds = array<i64: 1, 6, 256>}, {pipeline_mode = #tpu.pipeline_mode<synchronous>, transform_indices = @transform_1, window_bounds = array<i64: 64, 6>}, {pipeline_mode = #tpu.pipeline_mode<synchronous>, transform_indices = @transform_2, window_bounds = array<i64: 64, 1>}, {pipeline_mode = #tpu.pipeline_mode<synchronous>, transform_indices = @transform_3, window_bounds = array<i64: 128, 64>}, {pipeline_mode = #tpu.pipeline_mode<synchronous>, transform_indices = @transform_4, window_bounds = array<i64: 128, 1>}, {pipeline_mode = #tpu.pipeline_mode<synchronous>, transform_indices = @transform_5, window_bounds = array<i64: 128, 128>}, {pipeline_mode = #tpu.pipeline_mode<synchronous>, transform_indices = @transform_6, window_bounds = array<i64: 128, 1>}, {transform_indices = @transform_7, window_bounds = array<i64: 1, 1, 128, 1>}]} {
    %c0_i32 = arith.constant 0 : i32
    %0 = arith.cmpi eq, %arg2, %c0_i32 : i32
    %1 = arith.extui %0 : i1 to i32
    %c0_i32_0 = arith.constant 0 : i32
    %2 = arith.cmpi ne, %1, %c0_i32_0 : i32
    scf.if %2 {
      %cst_26 = arith.constant 0xFF800000 : f32
      %42 = vector.broadcast %cst_26 : f32 to vector<128x128xf32>
      %c0_27 = arith.constant 0 : index
      %c0_28 = arith.constant 0 : index
      %43 = vector.load %arg11[%c0_27, %c0_28] : memref<128x128xf32, #tpu.memory_space<vmem>>, vector<128x128xf32>
      tpu.vector_store %arg11[%c0_27, %c0_28], %42 {strides = array<i32>} : memref<128x128xf32, #tpu.memory_space<vmem>>, vector<128x128xf32>,
    } else {
    }
    %c0 = arith.constant 0 : index
    %c0_1 = arith.constant 0 : index
    %c0_2 = arith.constant 0 : index
    %3 = vector.load %arg3[%c0, %c0_1, %c0_2] : memref<1x6x256xf32, #tpu.memory_space<vmem>>, vector<1x6x256xf32>
    %4 = vector.shape_cast %3 : vector<1x6x256xf32> to vector<6x256xf32>
    %5 = arith.truncf %4 : vector<6x256xf32> to vector<6x256xbf16>
    %c0_3 = arith.constant 0 : index
    %c0_4 = arith.constant 0 : index
    %6 = vector.load %arg4[%c0_3, %c0_4] : memref<64x6xbf16, #tpu.memory_space<vmem>>, vector<64x6xbf16>
    %cst = arith.constant dense<0.000000e+00> : vector<64x256xf32>
    %7 = tpu.matmul %6, %5, %cst {dimension_numbers = #tpu.dot_dimension_numbers<[1], [0], [0], [1], [0, 0, 1, 1], [], []>} : vector<64x6xbf16>, vector<6x256xbf16>, vector<64x256xf32> -> vector<64x256xf32>
    %c0_5 = arith.constant 0 : index
    %c0_6 = arith.constant 0 : index
    %8 = vector.load %arg5[%c0_5, %c0_6] : memref<64x1xf32, #tpu.memory_space<vmem>>, vector<64x1xf32>
    %9 = vector.broadcast %8 : vector<64x1xf32> to vector<64x256xf32>
    %10 = arith.addf %7, %9 : vector<64x256xf32>
    %cst_7 = arith.constant 0.000000e+00 : f32
    %11 = vector.broadcast %cst_7 : f32 to vector<64x256xf32>
    %12 = arith.cmpf ogt, %10, %11 : vector<64x256xf32>
    %cst_8 = arith.constant 0.00999999977 : f32
    %13 = vector.broadcast %cst_8 : f32 to vector<64x256xf32>
    %14 = arith.mulf %13, %10 : vector<64x256xf32>
    %15 = arith.select %12, %10, %14 : vector<64x256xi1>, vector<64x256xf32>
    %c0_9 = arith.constant 0 : index
    %c0_10 = arith.constant 0 : index
    %16 = vector.load %arg6[%c0_9, %c0_10] : memref<128x64xbf16, #tpu.memory_space<vmem>>, vector<128x64xbf16>
    %17 = arith.truncf %15 : vector<64x256xf32> to vector<64x256xbf16>
    %cst_11 = arith.constant dense<0.000000e+00> : vector<128x256xf32>
    %18 = tpu.matmul %16, %17, %cst_11 {dimension_numbers = #tpu.dot_dimension_numbers<[1], [0], [0], [1], [0, 0, 1, 1], [], []>} : vector<128x64xbf16>, vector<64x256xbf16>, vector<128x256xf32> -> vector<128x256xf32>
    %c0_12 = arith.constant 0 : index
    %c0_13 = arith.constant 0 : index
    %19 = vector.load %arg7[%c0_12, %c0_13] : memref<128x1xf32, #tpu.memory_space<vmem>>, vector<128x1xf32>
    %20 = vector.broadcast %19 : vector<128x1xf32> to vector<128x256xf32>
    %21 = arith.addf %18, %20 : vector<128x256xf32>
    %cst_14 = arith.constant 0.000000e+00 : f32
    %22 = vector.broadcast %cst_14 : f32 to vector<128x256xf32>
    %23 = arith.cmpf ogt, %21, %22 : vector<128x256xf32>
    %cst_15 = arith.constant 0.00999999977 : f32
    %24 = vector.broadcast %cst_15 : f32 to vector<128x256xf32>
    %25 = arith.mulf %24, %21 : vector<128x256xf32>
    %26 = arith.select %23, %21, %25 : vector<128x256xi1>, vector<128x256xf32>
    %c0_16 = arith.constant 0 : index
    %c0_17 = arith.constant 0 : index
    %27 = vector.load %arg8[%c0_16, %c0_17] : memref<128x128xbf16, #tpu.memory_space<vmem>>, vector<128x128xbf16>
    %28 = arith.truncf %26 : vector<128x256xf32> to vector<128x256xbf16>
    %cst_18 = arith.constant dense<0.000000e+00> : vector<128x256xf32>
    %29 = tpu.matmul %27, %28, %cst_18 {dimension_numbers = #tpu.dot_dimension_numbers<[1], [0], [0], [1], [0, 0, 1, 1], [], []>} : vector<128x128xbf16>, vector<128x256xbf16>, vector<128x256xf32> -> vector<128x256xf32>
    %c0_19 = arith.constant 0 : index
    %c0_20 = arith.constant 0 : index
    %30 = vector.load %arg9[%c0_19, %c0_20] : memref<128x1xf32, #tpu.memory_space<vmem>>, vector<128x1xf32>
    %31 = vector.broadcast %30 : vector<128x1xf32> to vector<128x256xf32>
    %32 = arith.addf %29, %31 : vector<128x256xf32>
    %c0_21 = arith.constant 0 : index
    %c0_22 = arith.constant 0 : index
    %33 = vector.load %arg11[%c0_21, %c0_22] : memref<128x128xf32, #tpu.memory_space<vmem>>, vector<128x128xf32>
    %34 = vector.extract_strided_slice %32 {offsets = [0, 0], sizes = [128, 128], strides = [1, 1]} : vector<128x256xf32> to vector<128x128xf32>
    %35 = arith.maximumf %33, %34 : vector<128x128xf32>
    %36 = vector.extract_strided_slice %32 {offsets = [0, 128], sizes = [128, 128], strides = [1, 1]} : vector<128x256xf32> to vector<128x128xf32>
    %37 = arith.maximumf %35, %36 : vector<128x128xf32>
    %c0_23 = arith.constant 0 : index
    %c0_24 = arith.constant 0 : index
    %38 = vector.load %arg11[%c0_23, %c0_24] : memref<128x128xf32, #tpu.memory_space<vmem>>, vector<128x128xf32>
    tpu.vector_store %arg11[%c0_23, %c0_24], %37 {strides = array<i32>} : memref<128x128xf32, #tpu.memory_space<vmem>>, vector<128x128xf32>,
    %c1_i32 = arith.constant 1 : i32
    %39 = arith.cmpi eq, %arg2, %c1_i32 : i32
    %40 = arith.extui %39 : i1 to i32
    %c0_i32_25 = arith.constant 0 : i32
    %41 = arith.cmpi ne, %40, %c0_i32_25 : i32
    scf.if %41 {
      %c0_26 = arith.constant 0 : index
      %c0_27 = arith.constant 0 : index
      %42 = vector.load %arg11[%c0_26, %c0_27] : memref<128x128xf32, #tpu.memory_space<vmem>>, vector<128x128xf32>
      %cst_28 = arith.constant dense<0xFF800000> : vector<128xf32>
      %43 = vector.multi_reduction <maximumf>, %42, %cst_28 [1] : vector<128x128xf32> to vector<128xf32>
      %44 = vector.shape_cast %43 : vector<128xf32> to vector<128x1xf32>
      %45 = vector.shape_cast %44 : vector<128x1xf32> to vector<1x1x128x1xf32>
      %c0_29 = arith.constant 0 : index
      %c0_30 = arith.constant 0 : index
      %c0_31 = arith.constant 0 : index
      %c0_32 = arith.constant 0 : index
      %46 = vector.load %arg10[%c0_29, %c0_30, %c0_31, %c0_32] : memref<1x1x128x1xf32, #tpu.memory_space<vmem>>, vector<1x1x128x1xf32>
      tpu.vector_store %arg10[%c0_29, %c0_30, %c0_31, %c0_32], %45 {strides = array<i32>} : memref<1x1x128x1xf32, #tpu.memory_space<vmem>>, vector<1x1x128x1xf32>,
    } else {
    }
    return
  }
  func.func @transform_0(%arg0: i32, %arg1: i32, %arg2: i32) -> (i32, i32, i32) {
    %c2_i32 = arith.constant 2 : i32
    %0 = arith.muli %arg1, %c2_i32 : i32
    %1 = arith.addi %0, %arg2 : i32
    %c0_i32 = arith.constant 0 : i32
    %c0_i32_0 = arith.constant 0 : i32
    return %arg0, %c0_i32, %1 : i32, i32, i32
  }
  func.func @transform_1(%arg0: i32, %arg1: i32, %arg2: i32) -> (i32, i32) {
    %c0_i32 = arith.constant 0 : i32
    %c0_i32_0 = arith.constant 0 : i32
    %c0_i32_1 = arith.constant 0 : i32
    return %c0_i32, %c0_i32_0 : i32, i32
  }
  func.func @transform_2(%arg0: i32, %arg1: i32, %arg2: i32) -> (i32, i32) {
    %c0_i32 = arith.constant 0 : i32
    %c0_i32_0 = arith.constant 0 : i32
    %c0_i32_1 = arith.constant 0 : i32
    return %c0_i32, %c0_i32_0 : i32, i32
  }
  func.func @transform_3(%arg0: i32, %arg1: i32, %arg2: i32) -> (i32, i32) {
    %c0_i32 = arith.constant 0 : i32
    %c0_i32_0 = arith.constant 0 : i32
    %c0_i32_1 = arith.constant 0 : i32
    return %c0_i32, %c0_i32_0 : i32, i32
  }
  func.func @transform_4(%arg0: i32, %arg1: i32, %arg2: i32) -> (i32, i32) {
    %c0_i32 = arith.constant 0 : i32
    %c0_i32_0 = arith.constant 0 : i32
    %c0_i32_1 = arith.constant 0 : i32
    return %c0_i32, %c0_i32_0 : i32, i32
  }
  func.func @transform_5(%arg0: i32, %arg1: i32, %arg2: i32) -> (i32, i32) {
    %c0_i32 = arith.constant 0 : i32
    %c0_i32_0 = arith.constant 0 : i32
    %c0_i32_1 = arith.constant 0 : i32
    return %c0_i32, %c0_i32_0 : i32, i32
  }
  func.func @transform_6(%arg0: i32, %arg1: i32, %arg2: i32) -> (i32, i32) {
    %c0_i32 = arith.constant 0 : i32
    %c0_i32_0 = arith.constant 0 : i32
    %c0_i32_1 = arith.constant 0 : i32
    return %c0_i32, %c0_i32_0 : i32, i32
  }
  func.func @transform_7(%arg0: i32, %arg1: i32, %arg2: i32) -> (i32, i32, i32, i32) {
    %c0_i32 = arith.constant 0 : i32
    %c0_i32_0 = arith.constant 0 : i32
    %c0_i32_1 = arith.constant 0 : i32
    return %arg0, %arg1, %c0_i32, %c0_i32_0 : i32, i32, i32, i32
  }
}

</mosaic_0001>

<bundles_post_ra>
// kernel: pointnet_forward.1
= control target key start
LH: loop header
LB: loop body
LE: loop exit
PB: predicated region body
PF: predicated region fallthrough
CT: control target
= control target key end

     0   :  { %s1739_s24 = smov 0   ;;  %s1741_s25 = smov 0   ;;  %s2106_s0 = inlined_call_operand.vmem [shape: f32[2,6,1024], index: 0, kind: input, shape index: {}]   ;;  %s2107_s1 = inlined_call_operand.vmem [shape: bf16[64,6], index: 1, kind: input, shape index: {}]   ;;  %s2108_s2 = inlined_call_operand.vmem [shape: f32[64,1], index: 2, kind: input, shape index: {}]   ;;  %s2109_s3 = inlined_call_operand.vmem [shape: bf16[128,64], index: 3, kind: input, shape index: {}]   ;;  %s2110_s4 = inlined_call_operand.vmem [shape: f32[128,1], index: 4, kind: input, shape index: {}]   ;;  %s2111_s5 = inlined_call_operand.vmem [shape: bf16[128,128], index: 5, kind: input, shape index: {}]   ;;  %s2112_s6 = inlined_call_operand.vmem [shape: f32[128,1], index: 6, kind: input, shape index: {}]   ;;  %s2113_s7 = inlined_call_operand.vmem [shape: f32[2,2,128,1], index: 7, kind: output, shape index: {}]  }
   0x1   :  { %s1743_s26 = smov 0   ;;  %s1745_s27 = smov 0  }
   0x2   :  { %s1747_s28 = smov 0   ;;  %s1749_s29 = smov 0  }
   0x3   :  { %s1751_s30 = smov 0  }
   0x4 LB: > { %s29_s8 = sadd.s32 1, %s1683_s27  ;;  %s32_s9 = sadd.s32 1, %s1687_s28  ;;  %s1695_s30 = sphi %s1751_s30, %s17_s30   ;;  %s1691_s29 = sphi %s1749_s29, %s2123_s29   ;;  %s1687_s28 = sphi %s1747_s28, %s2122_s28   ;;  %s1683_s27 = sphi %s1745_s27, %s2121_s27   ;;  %s1679_s26 = sphi %s1743_s26, %s2120_s26   ;;  %s1675_s25 = sphi %s1741_s25, %s2119_s25   ;;  %s1671_s24 = sphi %s1739_s24, %s2118_s24  }
   0x5   : > { %p30_p0 = scmp.ge.s32.totalorder %s29_s8, 2  ;;  %p1500_p1 = scmp.ge.s32.totalorder %s1695_s30, 1 }
   0x6   : > { %p273_p2 = scmp.lt.s32.totalorder %s1695_s30, 9  ;;  %s36_s10 = sadd.s32 1, %s1691_s29 }
   0x7   : > { %s2125_s8 = smov (%p30_p0, %s29_s8), 0  ;;  %s2127_s9 = smov (!%p30_p0, %s32_s9), %s1687_s28 }
   0x8   : > { %p274_p3 = pnand %p1500_p1, %p273_p2  ;;  %p34_p4 = scmp.ge.s32.totalorder %s2127_s9, 2 }
   0x9   : > { %s1501_s11 = sshll.u32 (!%p274_p3), %s1675_s25, 1  ;;  %p318_p6 = scmp.lt.s32.totalorder (!%p274_p3), %s1679_s26, 1 }
   0xa   : > { %s2129_s9 = smov (%p34_p4, %s2127_s9), 0  ;;  %s2131_s10 = smov (!%p34_p4, %s36_s10), %s1691_s29 }
   0xb   : > { %2114 = sst [smem:[#allocation3_spill]] %s2129_s9  ;;  %p38_p5 = scmp.ge.s32.totalorder %s2131_s10, 2 }
   0xc   : > { %277 = sbr.rel (%p274_p3) target bundleno = 999 (0x3e7), region = 48  ;;  %s316_s12 = sadd.s32 (!%p274_p3), %s1671_s24, %s1501_s11 }
   0xd   : > { %s2133_s10 = smov (%p38_p5, %s2131_s10), 0  ;;  %s1502_s13 = sshll.u32 (!%p274_p3), %s316_s12, 1 }
   0xe   : > { %2115 = sst [smem:[#allocation4_spill]] %s2133_s10  ;;  %p331_p7 = scmp.lt.s32.totalorder (!%p274_p3), %s1675_s25, 1 }
   0xf   : > { %p320_p8 = scmp.lt.s32.totalorder (!%p274_p3), %s1502_s13, 7  ;;  %p1508_p9 = scmp.ne.s32.totalorder (!%p274_p3), %s1671_s24, 0 }
  0x13   : > { %s2135_s26 = smov (!%p318_p6, %s1679_s26), 1  ;;  %s2137_s13 = smov (!%p320_p8, %s1502_s13), 7 }
  0x14   : > { %s1503_s14 = sshll.u32 %s2135_s26, 3  ;;  %s1506_s15 = sshll.u32 %s2135_s26, 5  ;;  %v1697_v0 = vmov (!%p1508_p9), -inf  }
  0x15   : > { %s2139_s25 = smov (!%p331_p7, %s1675_s25), 1  ;;  %s323_s16 = sadd.s32 %s1503_s14, %s2137_s13  ;;  %343 = vst [vmem:[#allocation2] sm:$0xff] (!%p1508_p9), %v1697_v0  ;;  %344 = vst [vmem:[#allocation2 + $0x8] sm:$0xff] (!%p1508_p9), %v1697_v0 }
  0x16   : > { %s1504_s17 = sshll.u32 %s323_s16, 3  ;;  %s1505_s18 = sshll.u32 %s2139_s25, 4  ;;  %345 = vst [vmem:[#allocation2 + $0x10] sm:$0xff] (!%p1508_p9), %v1697_v0  ;;  %346 = vst [vmem:[#allocation2 + $0x18] sm:$0xff] (!%p1508_p9), %v1697_v0 }
  0x17   : > { %s325_s21 = scalar_lea.vmem %s2106_s0, %s1504_s17  ;;  %s335_s22 = sadd.s32 %s1506_s15, %s1505_s18  ;;  %347 = vst [vmem:[#allocation2 + $0x20] sm:$0xff] (!%p1508_p9), %v1697_v0  ;;  %348 = vst [vmem:[#allocation2 + $0x28] sm:$0xff] (!%p1508_p9), %v1697_v0 }
  0x18   : > { %s1507_s23 = sshll.u32 %s335_s22, 3  ;;  %342 = sbr.rel (%p1508_p9) target bundleno = 31 (0x1f), region = 52  ;;  %349 = vst [vmem:[#allocation2 + $0x30] sm:$0xff] (!%p1508_p9), %v1697_v0  ;;  %350 = vst [vmem:[#allocation2 + $0x38] sm:$0xff] (!%p1508_p9), %v1697_v0 }
  0x19   : > { %s1795_s11 = scalar_lea.vmem %s2113_s7, %s1507_s23  ;;  %351 = vst [vmem:[#allocation2 + $0x40] sm:$0xff] (!%p1508_p9), %v1697_v0  ;;  %352 = vst [vmem:[#allocation2 + $0x48] sm:$0xff] (!%p1508_p9), %v1697_v0 }
  0x1a   : > { %353 = vst [vmem:[#allocation2 + $0x50] sm:$0xff] (!%p1508_p9), %v1697_v0  ;;  %354 = vst [vmem:[#allocation2 + $0x58] sm:$0xff] (!%p1508_p9), %v1697_v0 }
  0x1b   : > { %355 = vst [vmem:[#allocation2 + $0x60] sm:$0xff] (!%p1508_p9), %v1697_v0  ;;  %356 = vst [vmem:[#allocation2 + $0x68] sm:$0xff] (!%p1508_p9), %v1697_v0 }
  0x1c   : > { %357 = vst [vmem:[#allocation2 + $0x70] sm:$0xff] (!%p1508_p9), %v1697_v0  ;;  %358 = vst [vmem:[#allocation2 + $0x78] sm:$0xff] (!%p1508_p9), %v1697_v0 }
  0x1f PF: > { %v360_v1 = vld [vmem:[%s325_s21 + $0x8] sm:$0x3f]  ;;  %vm452_vm0 = vcmask 1042432   ;;  %v359_v2 = vld [vmem:[%s325_s21] sm:$0x3f]  ;;  %v1698_v5 = vmov 0  }
  0x20   : > { %v362_v3 = vpack.c.bf16 %v360_v1, %v360_v1  ;;  %v361_v4 = vpack.c.bf16 %v359_v2, %v359_v2  ;;  %491 = vmatprep.mubr.bf16.mxu0 %v1698_v5  ;;  %1619 = vset.pattern.permute.xlu0 %v1698_v5  ;;  %v1621_v7 = vld [vmem:[%s2107_s1] sm:$0xff]   ;;  %vm439_vm1 = vcmask 48128   ;;  %v373_v9 = vld [vmem:[%s2108_s2 + $0x10] sm:$0xff]  ;;  %v372_v10 = vld [vmem:[%s2108_s2 + $0x8] sm:$0xff]  ;;  %p1542_p10 = scmp.ne.s32.totalorder %s1671_s24, 1 }
  0x21   : > { %1620 = vset.pattern.permute.xlu1 %v1698_v5  ;;  %797 = vmatprep.mubr.bf16.mxu1 %v1698_v5  ;;  %v371_v8 = vld [vmem:[%s2108_s2] sm:$0xff]  ;;  %v374_v11 = vld [vmem:[%s2108_s2 + $0x18] sm:$0xff]  ;;  %v376_v13 = vld [vmem:[%s2108_s2 + $0x28] sm:$0xff] }
  0x22   : > { %1513 = vmatprep.subr.msk.bf16.mxu0 %vm452_vm0, %v362_v3  ;;  %v454_v6 = vsel %vm452_vm0, %v361_v4, 0  ;;  %381 = vperm.xlu0 %1619, %v371_v8   ;;  %v375_v12 = vld [vmem:[%s2108_s2 + $0x20] sm:$0xff]  ;;  %v1622_v14 = vld [vmem:[%s2107_s1 + $0x8] sm:$0xff]   ;;  %v377_v15 = vld [vmem:[%s2108_s2 + $0x30] sm:$0xff] }
  0x23   : > { %460 = vmatpush1.bf16.msra.mxu0 %v454_v6  ;;  %391 = vperm.xlu1 %1620, %v373_v9   ;;  %v378_v16 = vld [vmem:[%s2108_s2 + $0x38] sm:$0xff]  ;;  %v1623_v17 = vld [vmem:[%s2107_s1 + $0x10] sm:$0xff]   ;;  %v604_v18 = vld [vmem:[%s2110_s4] sm:$0xff] }
  0x24   : > { %v605_v19 = vld [vmem:[%s2110_s4 + $0x8] sm:$0xff]  ;;  %v606_v20 = vld [vmem:[%s2110_s4 + $0x10] sm:$0xff]  ;;  %v607_v21 = vld [vmem:[%s2110_s4 + $0x18] sm:$0xff] }
  0x25   : > { %v608_v22 = vld [vmem:[%s2110_s4 + $0x20] sm:$0xff]  ;;  %v609_v23 = vld [vmem:[%s2110_s4 + $0x28] sm:$0xff]  ;;  %v1624_v24 = vld [vmem:[%s2107_s1 + $0x18] sm:$0xff]  }
  0x26   : > { %1514 = vmatmul.mubr.msk.bf16.vlgmr.msra.gmra.mrb[0].mxu0 %vm439_vm1, %v1621_v7  ;;  %386 = vperm.xlu0 %1619, %v372_v10   ;;  %v610_v25 = vld [vmem:[%s2110_s4 + $0x30] sm:$0xff]  ;;  %v611_v26 = vld [vmem:[%s2110_s4 + $0x38] sm:$0xff]  ;;  %v612_v27 = vld [vmem:[%s2110_s4 + $0x40] sm:$0xff] }
  0x27   : > { %501 = vmatprep.mubr.bf16.mxu0 %v1698_v5  ;;  %396 = vperm.xlu1 %1620, %v374_v11   ;;  %v613_v28 = vld [vmem:[%s2110_s4 + $0x48] sm:$0xff]  ;;  %v614_v29 = vld [vmem:[%s2110_s4 + $0x50] sm:$0xff]  ;;  %v615_v30 = vld [vmem:[%s2110_s4 + $0x58] sm:$0xff] }
  0x28   : > { %v616_v31 = vld [vmem:[%s2110_s4 + $0x60] sm:$0xff]  ;;  %v617_v32 = vld [vmem:[%s2110_s4 + $0x68] sm:$0xff]  ;;  %v618_v33 = vld [vmem:[%s2110_s4 + $0x70] sm:$0xff] }
  0x29   : > { %v619_v34 = vld [vmem:[%s2110_s4 + $0x78] sm:$0xff]  ;;  %v1006_v35 = vld [vmem:[%s2112_s6] sm:$0xff]  ;;  %v1007_v36 = vld [vmem:[%s2112_s6 + $0x8] sm:$0xff] }
  0x2a   : > { %401 = vperm.xlu0 %1619, %v375_v12   ;;  %v1008_v37 = vld [vmem:[%s2112_s6 + $0x10] sm:$0xff]  ;;  %v1009_v38 = vld [vmem:[%s2112_s6 + $0x18] sm:$0xff]  ;;  %v1010_v39 = vld [vmem:[%s2112_s6 + $0x20] sm:$0xff] }
  0x2b   : > { %406 = vperm.xlu1 %1620, %v376_v13   ;;  %v1011_v40 = vld [vmem:[%s2112_s6 + $0x28] sm:$0xff]  ;;  %v1012_v41 = vld [vmem:[%s2112_s6 + $0x30] sm:$0xff]  ;;  %v1013_v42 = vld [vmem:[%s2112_s6 + $0x38] sm:$0xff] }
  0x2c   : > { %v1014_v43 = vld [vmem:[%s2112_s6 + $0x40] sm:$0xff]  ;;  %v1015_v44 = vld [vmem:[%s2112_s6 + $0x48] sm:$0xff]  ;;  %v1016_v45 = vld [vmem:[%s2112_s6 + $0x50] sm:$0xff] }
  0x2d   : > { %v1017_v46 = vld [vmem:[%s2112_s6 + $0x58] sm:$0xff]  ;;  %v1018_v47 = vld [vmem:[%s2112_s6 + $0x60] sm:$0xff]  ;;  %v1019_v48 = vld [vmem:[%s2112_s6 + $0x68] sm:$0xff] }
  0x2e   : > { %1515 = vmatmul.mubr.msk.bf16.gmra.mrb[4].mxu0 %vm439_vm1, %v1622_v14  ;;  %411 = vperm.xlu0 %1619, %v377_v15   ;;  %v1020_v49 = vld [vmem:[%s2112_s6 + $0x70] sm:$0xff]  ;;  %v1021_v50 = vld [vmem:[%s2112_s6 + $0x78] sm:$0xff] }
  0x2f   : > { %511 = vmatprep.mubr.bf16.mxu0 %v1698_v5  ;;  %416 = vperm.xlu1 %1620, %v378_v16  }
  0x32   : > { %622 = vperm.xlu0 %1619, %v604_v18  }
  0x33   : > { %627 = vperm.xlu1 %1620, %v605_v19  }
  0x36   : > { %1516 = vmatmul.mubr.msk.bf16.gmra.mrb[8].mxu0 %vm439_vm1, %v1623_v17  ;;  %632 = vperm.xlu0 %1619, %v606_v20  }
  0x37   : > { %521 = vmatprep.mubr.bf16.mxu0 %v1698_v5  ;;  %637 = vperm.xlu1 %1620, %v607_v21  }
  0x3a   : > { %642 = vperm.xlu0 %1619, %v608_v22  }
  0x3b   : > { %647 = vperm.xlu1 %1620, %v609_v23  }
  0x3e   : > { %1517 = vmatmul.mubr.msk.bf16.gmra.mrb[12].mxu0 %vm439_vm1, %v1624_v24  ;;  %652 = vperm.xlu0 %1619, %v610_v25  }
  0x3f   : > { %1182 = vmatprep.mubr.bf16.mxu0 %v1698_v5  ;;  %657 = vperm.xlu1 %1620, %v611_v26  }
  0x42   : > { %662 = vperm.xlu0 %1619, %v612_v27  }
  0x43   : > { %667 = vperm.xlu1 %1620, %v613_v28  }
  0x46   : > { %672 = vperm.xlu0 %1619, %v614_v29  }
  0x47   : > { %677 = vperm.xlu1 %1620, %v615_v30  }
  0x4a   : > { %682 = vperm.xlu0 %1619, %v616_v31  }
  0x4b   : > { %687 = vperm.xlu1 %1620, %v617_v32  }
  0x4e   : > { %692 = vperm.xlu0 %1619, %v618_v33  }
  0x4f   : > { %697 = vperm.xlu1 %1620, %v619_v34  }
  0x52   : > { %1024 = vperm.xlu0 %1619, %v1006_v35  }
  0x53   : > { %1029 = vperm.xlu1 %1620, %v1007_v36  }
  0x56   : > { %1034 = vperm.xlu0 %1619, %v1008_v37  }
  0x57   : > { %1039 = vperm.xlu1 %1620, %v1009_v38  }
  0x5a   : > { %1044 = vperm.xlu0 %1619, %v1010_v39  }
  0x5b   : > { %1049 = vperm.xlu1 %1620, %v1011_v40  }
  0x5e   : > { %1054 = vperm.xlu0 %1619, %v1012_v41  }
  0x5f   : > { %1059 = vperm.xlu1 %1620, %v1013_v42  }
  0x62   : > { %1064 = vperm.xlu0 %1619, %v1014_v43  }
  0x63   : > { %1069 = vperm.xlu1 %1620, %v1015_v44  }
  0x66   : > { %1074 = vperm.xlu0 %1619, %v1016_v45  }
  0x67   : > { %1079 = vperm.xlu1 %1620, %v1017_v46  }
  0x6a   : > { %1084 = vperm.xlu0 %1619, %v1018_v47  }
  0x6b   : > { %1089 = vperm.xlu1 %1620, %v1019_v48  }
  0x6e   : > { %1094 = vperm.xlu0 %1619, %v1020_v49  }
  0x6f   : > { %1099 = vperm.xlu1 %1620, %v1021_v50  }
  0xa1   : > { %v382_v51 = vpop.permute.xlu0 %381 }
  0xa2   : > { %v392_v61 = vpop.permute.xlu1 %391 }
  0xa5   : > { %v387_v55 = vpop.permute.xlu0 %386 }
  0xa6   : > { %v397_v12 = vpop.permute.xlu1 %396 }
  0xa9   : > { %v402_v24 = vpop.permute.xlu0 %401 }
  0xaa   : > { %v407_v32 = vpop.permute.xlu1 %406 }
  0xad   : > { %v412_v44 = vpop.permute.xlu0 %411 }
  0xf9   : > { %v493_v52 = vpop.f32.mrb[0].mxu0 }
  0xfa   : > { %v494_v53 = vadd.f32 %v493_v52, %v382_v51  ;;  %v495_v54 = vpop.f32.mrb[1].mxu0  ;;  %v417_v52 = vpop.permute.xlu1 %416 }
  0xfb   : > { %v496_v56 = vadd.f32 %v495_v54, %v382_v51  ;;  %v497_v57 = vpop.f32.mrb[2].mxu0 }
  0xfc   : > { %v548_v58 = vmul.f32 0.01, %v494_v53  ;;  %v498_v59 = vadd.f32 %v497_v57, %v387_v55  ;;  %v499_v60 = vpop.f32.mrb[3].mxu0  ;;  %vm532_vm2 = vcmp.gt.f32.partialorder %v494_v53, 0.0 }
  0xfd   : > { %v549_v62 = vmul.f32 0.01, %v496_v56  ;;  %v500_v63 = vadd.f32 %v499_v60, %v387_v55  ;;  %vm533_vm3 = vcmp.gt.f32.partialorder %v496_v56, 0.0 }
  0xfe   : > { %v550_v0 = vmul.f32 0.01, %v498_v59  ;;  %vm534_vm4 = vcmp.gt.f32.partialorder %v498_v59, 0.0  ;;  %v564_v2 = vsel %vm532_vm2, %v494_v53, %v548_v58  ;;  %vm740_vm2 = vcmask 523264  }
  0xff   : > { %v551_v1 = vmul.f32 0.01, %v500_v63  ;;  %vm535_vm5 = vcmp.gt.f32.partialorder %v500_v63, 0.0  ;;  %v565_v6 = vsel %vm533_vm3, %v496_v56, %v549_v62 }
 0x100   : > { %v566_v3 = vsel %vm534_vm4, %v498_v59, %v550_v0 }
 0x101   : > { %v503_v4 = vpop.f32.mrb[4].mxu0  ;;  %v567_v7 = vsel %vm535_vm5, %v500_v63, %v551_v1  ;;  %v596_v8 = vpack.c.bf16 %v566_v3, %v564_v2 }
 0x102   : > { %v504_v9 = vadd.f32 %v503_v4, %v392_v61  ;;  %v505_v10 = vpop.f32.mrb[5].mxu0  ;;  %v597_v11 = vpack.c.bf16 %v567_v7, %v565_v6  ;;  %v1625_v4 = vld [vmem:[%s2109_s3] sm:$0xff]   ;;  %v1626_v6 = vld [vmem:[%s2109_s3 + $0x8] sm:$0xff]   ;;  %v1627_v7 = vld [vmem:[%s2109_s3 + $0x10] sm:$0xff]  }
 0x103   : > { %v506_v13 = vadd.f32 %v505_v10, %v392_v61  ;;  %v507_v14 = vpop.f32.mrb[6].mxu0  ;;  %v1630_v10 = vld [vmem:[%s2109_s3 + $0x28] sm:$0xff]  }
 0x104   : > { %v552_v15 = vmul.f32 0.01, %v504_v9  ;;  %v508_v16 = vadd.f32 %v507_v14, %v397_v12  ;;  %v509_v17 = vpop.f32.mrb[7].mxu0  ;;  %765 = vmatprep.subr.bf16.mxu1 %v597_v11  ;;  %vm536_vm6 = vcmp.gt.f32.partialorder %v504_v9, 0.0  ;;  %v1631_v11 = vld [vmem:[%s2109_s3 + $0x30] sm:$0xff]  }
 0x105   : > { %v553_v18 = vmul.f32 0.01, %v506_v13  ;;  %v510_v19 = vadd.f32 %v509_v17, %v397_v12  ;;  %766 = vmatpush1.bf16.msra.mxu1 %v596_v8  ;;  %vm537_vm7 = vcmp.gt.f32.partialorder %v506_v13, 0.0  ;;  %v1628_v8 = vld [vmem:[%s2109_s3 + $0x18] sm:$0xff]   ;;  %v628_v17 = vpop.permute.xlu1 %627 }
 0x106   : > { %vm538_vm8 = vcmp.gt.f32.partialorder %v508_v16, 0.0  ;;  %v554_v20 = vmul.f32 0.01, %v508_v16  ;;  %v568_v22 = vsel %vm536_vm6, %v504_v9, %v552_v15  ;;  %v1629_v9 = vld [vmem:[%s2109_s3 + $0x20] sm:$0xff]   ;;  %v1632_v12 = vld [vmem:[%s2109_s3 + $0x38] sm:$0xff]  }
 0x107   : > { %vm539_vm9 = vcmp.gt.f32.partialorder %v510_v19, 0.0  ;;  %v555_v21 = vmul.f32 0.01, %v510_v19  ;;  %v569_v26 = vsel %vm537_vm7, %v506_v13, %v553_v18  ;;  %v623_v13 = vpop.permute.xlu0 %622 }
 0x108   : > { %v570_v23 = vsel %vm538_vm8, %v508_v16, %v554_v20 }
 0x109   : > { %v513_v25 = vpop.f32.mrb[8].mxu0  ;;  %v571_v27 = vsel %vm539_vm9, %v510_v19, %v555_v21  ;;  %v598_v28 = vpack.c.bf16 %v570_v23, %v568_v22 }
 0x10a   : > { %v514_v29 = vadd.f32 %v513_v25, %v402_v24  ;;  %v515_v30 = vpop.f32.mrb[9].mxu0  ;;  %v599_v31 = vpack.c.bf16 %v571_v27, %v569_v26 }
 0x10b   : > { %v516_v33 = vadd.f32 %v515_v30, %v402_v24  ;;  %v517_v34 = vpop.f32.mrb[10].mxu0 }
 0x10c   : > { %v556_v35 = vmul.f32 0.01, %v514_v29  ;;  %v518_v36 = vadd.f32 %v517_v34, %v407_v32  ;;  %v519_v37 = vpop.f32.mrb[11].mxu0  ;;  %767 = vmatprep.subr.bf16.mxu1 %v599_v31  ;;  %vm540_vm10 = vcmp.gt.f32.partialorder %v514_v29, 0.0 }
 0x10d   : > { %v557_v38 = vmul.f32 0.01, %v516_v33  ;;  %v520_v39 = vadd.f32 %v519_v37, %v407_v32  ;;  %768 = vmatpush1.bf16.msra.mxu1 %v598_v28  ;;  %vm541_vm11 = vcmp.gt.f32.partialorder %v516_v33, 0.0  ;;  %v638_v37 = vpop.permute.xlu1 %637 }
 0x10e   : > { %vm542_vm12 = vcmp.gt.f32.partialorder %v518_v36, 0.0  ;;  %v558_v40 = vmul.f32 0.01, %v518_v36  ;;  %v572_v42 = vsel %vm540_vm10, %v514_v29, %v556_v35  ;;  %v633_v29 = vpop.permute.xlu0 %632 }
 0x10f   : > { %vm543_vm13 = vcmp.gt.f32.partialorder %v520_v39, 0.0  ;;  %v559_v41 = vmul.f32 0.01, %v520_v39  ;;  %v573_v46 = vsel %vm541_vm11, %v516_v33, %v557_v38 }
 0x110   : > { %v574_v43 = vsel %vm542_vm12, %v518_v36, %v558_v40 }
 0x111   : > { %v523_v45 = vpop.f32.mrb[12].mxu0  ;;  %v575_v47 = vsel %vm543_vm13, %v520_v39, %v559_v41  ;;  %v600_v48 = vpack.c.bf16 %v574_v43, %v572_v42 }
 0x112   : > { %v524_v49 = vadd.f32 %v523_v45, %v412_v44  ;;  %v525_v50 = vpop.f32.mrb[13].mxu0  ;;  %v601_v51 = vpack.c.bf16 %v575_v47, %v573_v46 }
 0x113   : > { %v526_v53 = vadd.f32 %v525_v50, %v412_v44  ;;  %v527_v54 = vpop.f32.mrb[14].mxu0 }
 0x114   : > { %v560_v55 = vmul.f32 0.01, %v524_v49  ;;  %v528_v56 = vadd.f32 %v527_v54, %v417_v52  ;;  %v529_v57 = vpop.f32.mrb[15].mxu0  ;;  %769 = vmatprep.subr.bf16.mxu1 %v601_v51  ;;  %vm544_vm14 = vcmp.gt.f32.partialorder %v524_v49, 0.0 }
 0x115   : > { %v561_v58 = vmul.f32 0.01, %v526_v53  ;;  %v530_v59 = vadd.f32 %v529_v57, %v417_v52  ;;  %770 = vmatpush1.bf16.msra.mxu1 %v600_v48  ;;  %vm545_vm15 = vcmp.gt.f32.partialorder %v526_v53, 0.0  ;;  %v648_v57 = vpop.permute.xlu1 %647 }
 0x116   : > { %vm546_vm0 = vcmp.gt.f32.partialorder %v528_v56, 0.0  ;;  %v562_v60 = vmul.f32 0.01, %v528_v56  ;;  %v576_v62 = vsel %vm544_vm14, %v524_v49, %v560_v55  ;;  %v643_v49 = vpop.permute.xlu0 %642 }
 0x117   : > { %vm547_vm1 = vcmp.gt.f32.partialorder %v530_v59, 0.0  ;;  %v563_v61 = vmul.f32 0.01, %v530_v59  ;;  %v577_v0 = vsel %vm545_vm15, %v526_v53, %v561_v58 }
 0x118   : > { %v578_v63 = vsel %vm546_vm0, %v528_v56, %v562_v60 }
 0x119   : > { %v579_v1 = vsel %vm547_vm1, %v530_v59, %v563_v61  ;;  %v602_v2 = vpack.c.bf16 %v578_v63, %v576_v62 }
 0x11a   : > { %v603_v3 = vpack.c.bf16 %v579_v1, %v577_v0 }
 0x11c   : > { %771 = vmatprep.subr.bf16.mxu1 %v603_v3 }
 0x11d   : > { %772 = vmatpush1.bf16.msra.mxu1 %v602_v2 }
 0x120   : > { %1526 = vmatmul.mubr.msk.bf16.vlgmr.msra.gmra.mrb[0].mxu1 %vm740_vm2, %v1625_v4 }
 0x121   : > { %807 = vmatprep.mubr.bf16.mxu1 %v1698_v5 }
 0x128   : > { %1527 = vmatmul.mubr.msk.bf16.gmra.mrb[4].mxu1 %vm740_vm2, %v1626_v6  ;;  %v653_v6 = vpop.permute.xlu0 %652 }
 0x129   : > { %817 = vmatprep.mubr.bf16.mxu1 %v1698_v5 }
 0x130   : > { %1528 = vmatmul.mubr.msk.bf16.gmra.mrb[8].mxu1 %vm740_vm2, %v1627_v7 }
 0x131   : > { %827 = vmatprep.mubr.bf16.mxu1 %v1698_v5 }
 0x138   : > { %1529 = vmatmul.mubr.msk.bf16.gmra.mrb[12].mxu1 %vm740_vm2, %v1628_v8 }
 0x139   : > { %837 = vmatprep.mubr.bf16.mxu1 %v1698_v5 }
 0x140   : > { %1530 = vmatmul.mubr.msk.bf16.gmra.mrb[16].mxu1 %vm740_vm2, %v1629_v9 }
 0x141   : > { %847 = vmatprep.mubr.bf16.mxu1 %v1698_v5 }
 0x148   : > { %1531 = vmatmul.mubr.msk.bf16.gmra.mrb[20].mxu1 %vm740_vm2, %v1630_v10 }
 0x149   : > { %857 = vmatprep.mubr.bf16.mxu1 %v1698_v5 }
 0x150   : > { %1532 = vmatmul.mubr.msk.bf16.gmra.mrb[24].mxu1 %vm740_vm2, %v1631_v11 }
 0x151   : > { %867 = vmatprep.mubr.bf16.mxu1 %v1698_v5 }
 0x158   : > { %1533 = vmatmul.mubr.msk.bf16.gmra.mrb[28].mxu1 %vm740_vm2, %v1632_v12 }
 0x159   : > { %1252 = vmatprep.mubr.bf16.mxu1 %v1698_v5 }
 0x1f3   : > { %v799_v14 = vpop.f32.mrb[0].mxu1 }
 0x1f4   : > { %v800_v15 = vadd.f32 %v799_v14, %v623_v13  ;;  %v801_v16 = vpop.f32.mrb[1].mxu1  ;;  %v658_v14 = vpop.permute.xlu1 %657 }
 0x1f5   : > { %v802_v18 = vadd.f32 %v801_v16, %v623_v13  ;;  %v803_v19 = vpop.f32.mrb[2].mxu1 }
 0x1f6   : > { %v910_v20 = vmul.f32 0.01, %v800_v15  ;;  %v804_v21 = vadd.f32 %v803_v19, %v628_v17  ;;  %v805_v22 = vpop.f32.mrb[3].mxu1  ;;  %vm878_vm3 = vcmp.gt.f32.partialorder %v800_v15, 0.0 }
 0x1f7   : > { %v911_v23 = vmul.f32 0.01, %v802_v18  ;;  %v806_v24 = vadd.f32 %v805_v22, %v628_v17  ;;  %vm879_vm4 = vcmp.gt.f32.partialorder %v802_v18, 0.0 }
 0x1f8   : > { %vm880_vm5 = vcmp.gt.f32.partialorder %v804_v21, 0.0  ;;  %v912_v25 = vmul.f32 0.01, %v804_v21  ;;  %v942_v27 = vsel %vm878_vm3, %v800_v15, %v910_v20 }
 0x1f9   : > { %vm881_vm6 = vcmp.gt.f32.partialorder %v806_v24, 0.0  ;;  %v913_v26 = vmul.f32 0.01, %v806_v24  ;;  %v943_v32 = vsel %vm879_vm4, %v802_v18, %v911_v23 }
 0x1fa   : > { %v944_v28 = vsel %vm880_vm5, %v804_v21, %v912_v25 }
 0x1fb   : > { %v990_v30 = vpack.c.bf16 %v944_v28, %v942_v27  ;;  %v809_v31 = vpop.f32.mrb[4].mxu1  ;;  %v945_v33 = vsel %vm881_vm6, %v806_v24, %v913_v26  ;;  %v663_v26 = vpop.permute.xlu0 %662 }
 0x1fc   : > { %v810_v34 = vadd.f32 %v809_v31, %v633_v29  ;;  %v811_v35 = vpop.f32.mrb[5].mxu1  ;;  %v991_v36 = vpack.c.bf16 %v945_v33, %v943_v32 }
 0x1fd   : > { %v812_v38 = vadd.f32 %v811_v35, %v633_v29  ;;  %v813_v39 = vpop.f32.mrb[6].mxu1 }
 0x1fe   : > { %v914_v40 = vmul.f32 0.01, %v810_v34  ;;  %v814_v41 = vadd.f32 %v813_v39, %v638_v37  ;;  %v815_v42 = vpop.f32.mrb[7].mxu1  ;;  %1150 = vmatprep.subr.bf16.mxu0 %v991_v36  ;;  %1545 = vmatprep.subr.bf16.mxu1 %v991_v36  ;;  %vm882_vm7 = vcmp.gt.f32.partialorder %v810_v34, 0.0 }
 0x1ff   : > { %v915_v43 = vmul.f32 0.01, %v812_v38  ;;  %v816_v44 = vadd.f32 %v815_v42, %v638_v37  ;;  %1151 = vmatpush1.bf16.msra.mxu0 %v990_v30  ;;  %1553 = vmatpush1.bf16.msra.mxu1 %v990_v30  ;;  %vm883_vm8 = vcmp.gt.f32.partialorder %v812_v38, 0.0 }
 0x200   : > { %vm884_vm9 = vcmp.gt.f32.partialorder %v814_v41, 0.0  ;;  %v916_v45 = vmul.f32 0.01, %v814_v41  ;;  %v946_v47 = vsel %vm882_vm7, %v810_v34, %v914_v40  ;;  %v668_v34 = vpop.permute.xlu1 %667 }
 0x201   : > { %vm885_vm10 = vcmp.gt.f32.partialorder %v816_v44, 0.0  ;;  %v917_v46 = vmul.f32 0.01, %v816_v44  ;;  %v947_v52 = vsel %vm883_vm8, %v812_v38, %v915_v43 }
 0x202   : > { %v948_v48 = vsel %vm884_vm9, %v814_v41, %v916_v45 }
 0x203   : > { %v992_v50 = vpack.c.bf16 %v948_v48, %v946_v47  ;;  %v819_v51 = vpop.f32.mrb[8].mxu1  ;;  %v949_v53 = vsel %vm885_vm10, %v816_v44, %v917_v46  ;;  %v673_v46 = vpop.permute.xlu0 %672 }
 0x204   : > { %v820_v54 = vadd.f32 %v819_v51, %v643_v49  ;;  %v821_v55 = vpop.f32.mrb[9].mxu1  ;;  %v993_v56 = vpack.c.bf16 %v949_v53, %v947_v52 }
 0x205   : > { %v822_v58 = vadd.f32 %v821_v55, %v643_v49  ;;  %v823_v59 = vpop.f32.mrb[10].mxu1 }
 0x206   : > { %v918_v60 = vmul.f32 0.01, %v820_v54  ;;  %v824_v61 = vadd.f32 %v823_v59, %v648_v57  ;;  %v825_v62 = vpop.f32.mrb[11].mxu1  ;;  %1152 = vmatprep.subr.bf16.mxu0 %v993_v56  ;;  %1546 = vmatprep.subr.bf16.mxu1 %v993_v56  ;;  %vm886_vm11 = vcmp.gt.f32.partialorder %v820_v54, 0.0 }
 0x207   : > { %v919_v63 = vmul.f32 0.01, %v822_v58  ;;  %v826_v0 = vadd.f32 %v825_v62, %v648_v57  ;;  %1153 = vmatpush1.bf16.msra.mxu0 %v992_v50  ;;  %1554 = vmatpush1.bf16.msra.mxu1 %v992_v50  ;;  %vm887_vm12 = vcmp.gt.f32.partialorder %v822_v58, 0.0 }
 0x208   : > { %vm888_vm13 = vcmp.gt.f32.partialorder %v824_v61, 0.0  ;;  %v920_v1 = vmul.f32 0.01, %v824_v61  ;;  %v950_v3 = vsel %vm886_vm11, %v820_v54, %v918_v60  ;;  %v678_v54 = vpop.permute.xlu1 %677 }
 0x209   : > { %vm889_vm14 = vcmp.gt.f32.partialorder %v826_v0, 0.0  ;;  %v921_v2 = vmul.f32 0.01, %v826_v0  ;;  %v951_v9 = vsel %vm887_vm12, %v822_v58, %v919_v63 }
 0x20a   : > { %v952_v4 = vsel %vm888_vm13, %v824_v61, %v920_v1 }
 0x20b   : > { %v994_v7 = vpack.c.bf16 %v952_v4, %v950_v3  ;;  %v829_v8 = vpop.f32.mrb[12].mxu1  ;;  %v953_v10 = vsel %vm889_vm14, %v826_v0, %v921_v2  ;;  %v683_v2 = vpop.permute.xlu0 %682 }
 0x20c   : > { %v830_v11 = vadd.f32 %v829_v8, %v653_v6  ;;  %v831_v12 = vpop.f32.mrb[13].mxu1  ;;  %v995_v13 = vpack.c.bf16 %v953_v10, %v951_v9 }
 0x20d   : > { %v832_v15 = vadd.f32 %v831_v12, %v653_v6  ;;  %v833_v16 = vpop.f32.mrb[14].mxu1 }
 0x20e   : > { %v922_v17 = vmul.f32 0.01, %v830_v11  ;;  %v834_v18 = vadd.f32 %v833_v16, %v658_v14  ;;  %v835_v19 = vpop.f32.mrb[15].mxu1  ;;  %1154 = vmatprep.subr.bf16.mxu0 %v995_v13  ;;  %1547 = vmatprep.subr.bf16.mxu1 %v995_v13  ;;  %vm890_vm15 = vcmp.gt.f32.partialorder %v830_v11, 0.0 }
 0x20f   : > { %v923_v20 = vmul.f32 0.01, %v832_v15  ;;  %v836_v21 = vadd.f32 %v835_v19, %v658_v14  ;;  %1155 = vmatpush1.bf16.msra.mxu0 %v994_v7  ;;  %1555 = vmatpush1.bf16.msra.mxu1 %v994_v7  ;;  %vm891_vm0 = vcmp.gt.f32.partialorder %v832_v15, 0.0 }
 0x210   : > { %vm892_vm1 = vcmp.gt.f32.partialorder %v834_v18, 0.0  ;;  %v924_v22 = vmul.f32 0.01, %v834_v18  ;;  %v954_v24 = vsel %vm890_vm15, %v830_v11, %v922_v17  ;;  %v688_v11 = vpop.permute.xlu1 %687 }
 0x211   : > { %vm893_vm2 = vcmp.gt.f32.partialorder %v836_v21, 0.0  ;;  %v925_v23 = vmul.f32 0.01, %v836_v21  ;;  %v955_v29 = vsel %vm891_vm0, %v832_v15, %v923_v20 }
 0x212   : > { %v956_v25 = vsel %vm892_vm1, %v834_v18, %v924_v22 }
 0x213   : > { %v996_v27 = vpack.c.bf16 %v956_v25, %v954_v24  ;;  %v839_v28 = vpop.f32.mrb[16].mxu1  ;;  %v957_v30 = vsel %vm893_vm2, %v836_v21, %v925_v23  ;;  %v693_v23 = vpop.permute.xlu0 %692 }
 0x214   : > { %v840_v31 = vadd.f32 %v839_v28, %v663_v26  ;;  %v841_v32 = vpop.f32.mrb[17].mxu1  ;;  %v997_v33 = vpack.c.bf16 %v957_v30, %v955_v29 }
 0x215   : > { %v842_v35 = vadd.f32 %v841_v32, %v663_v26  ;;  %v843_v36 = vpop.f32.mrb[18].mxu1 }
 0x216   : > { %v926_v37 = vmul.f32 0.01, %v840_v31  ;;  %v844_v38 = vadd.f32 %v843_v36, %v668_v34  ;;  %v845_v39 = vpop.f32.mrb[19].mxu1  ;;  %1156 = vmatprep.subr.bf16.mxu0 %v997_v33  ;;  %1548 = vmatprep.subr.bf16.mxu1 %v997_v33  ;;  %vm894_vm3 = vcmp.gt.f32.partialorder %v840_v31, 0.0 }
 0x217   : > { %v927_v40 = vmul.f32 0.01, %v842_v35  ;;  %v846_v41 = vadd.f32 %v845_v39, %v668_v34  ;;  %1157 = vmatpush1.bf16.msra.mxu0 %v996_v27  ;;  %1556 = vmatpush1.bf16.msra.mxu1 %v996_v27  ;;  %vm895_vm4 = vcmp.gt.f32.partialorder %v842_v35, 0.0 }
 0x218   : > { %vm896_vm5 = vcmp.gt.f32.partialorder %v844_v38, 0.0  ;;  %v928_v42 = vmul.f32 0.01, %v844_v38  ;;  %v958_v44 = vsel %vm894_vm3, %v840_v31, %v926_v37  ;;  %v698_v31 = vpop.permute.xlu1 %697  ;;  %vm1379_vm3 = vcmask (!%p1542_p10), 7168  }
 0x219   : > { %vm897_vm6 = vcmp.gt.f32.partialorder %v846_v41, 0.0  ;;  %v929_v43 = vmul.f32 0.01, %v846_v41  ;;  %v959_v49 = vsel %vm895_vm4, %v842_v35, %v927_v40 }
 0x21a   : > { %v960_v45 = vsel %vm896_vm5, %v844_v38, %v928_v42 }
 0x21b   : > { %v998_v47 = vpack.c.bf16 %v960_v45, %v958_v44  ;;  %v849_v48 = vpop.f32.mrb[20].mxu1  ;;  %v961_v50 = vsel %vm897_vm6, %v846_v41, %v929_v43 }
 0x21c   : > { %v850_v51 = vadd.f32 %v849_v48, %v673_v46  ;;  %v851_v52 = vpop.f32.mrb[21].mxu1  ;;  %v999_v53 = vpack.c.bf16 %v961_v50, %v959_v49  ;;  %v1634_v48 = vld [vmem:[%s2111_s5 + $0x38] sm:$0xff]   ;;  %v1635_v49 = vld [vmem:[%s2111_s5 + $0x8] sm:$0xff]   ;;  %v1636_v50 = vld [vmem:[%s2111_s5 + $0x10] sm:$0xff]  }
 0x21d   : > { %v852_v55 = vadd.f32 %v851_v52, %v673_v46  ;;  %v853_v56 = vpop.f32.mrb[22].mxu1  ;;  %v1638_v52 = vld [vmem:[%s2111_s5 + $0x20] sm:$0xff]  }
 0x21e   : > { %v930_v57 = vmul.f32 0.01, %v850_v51  ;;  %v854_v58 = vadd.f32 %v853_v56, %v678_v54  ;;  %v855_v59 = vpop.f32.mrb[23].mxu1  ;;  %1158 = vmatprep.subr.bf16.mxu0 %v999_v53  ;;  %1549 = vmatprep.subr.bf16.mxu1 %v999_v53  ;;  %vm898_vm7 = vcmp.gt.f32.partialorder %v850_v51, 0.0  ;;  %v1639_v53 = vld [vmem:[%s2111_s5 + $0x28] sm:$0xff]   ;;  %v1030_v56 = vpop.permute.xlu1 %1029 }
 0x21f   : > { %v931_v60 = vmul.f32 0.01, %v852_v55  ;;  %v856_v61 = vadd.f32 %v855_v59, %v678_v54  ;;  %1159 = vmatpush1.bf16.msra.mxu0 %v998_v47  ;;  %1557 = vmatpush1.bf16.msra.mxu1 %v998_v47  ;;  %vm899_vm8 = vcmp.gt.f32.partialorder %v852_v55, 0.0  ;;  %v1633_v47 = vld [vmem:[%s2111_s5] sm:$0xff]   ;;  %v1640_v54 = vld [vmem:[%s2111_s5 + $0x30] sm:$0xff]  }
 0x220   : > { %vm900_vm9 = vcmp.gt.f32.partialorder %v854_v58, 0.0  ;;  %v932_v62 = vmul.f32 0.01, %v854_v58  ;;  %v962_v0 = vsel %vm898_vm7, %v850_v51, %v930_v57  ;;  %v1637_v51 = vld [vmem:[%s2111_s5 + $0x18] sm:$0xff]  }
 0x221   : > { %vm901_vm10 = vcmp.gt.f32.partialorder %v856_v61, 0.0  ;;  %v933_v63 = vmul.f32 0.01, %v856_v61  ;;  %v963_v6 = vsel %vm899_vm8, %v852_v55, %v931_v60  ;;  %v1025_v55 = vpop.permute.xlu0 %1024 }
 0x222   : > { %v964_v1 = vsel %vm900_vm9, %v854_v58, %v932_v62  ;;  %v1040_v58 = vpop.permute.xlu1 %1039 }
 0x223   : > { %v1000_v3 = vpack.c.bf16 %v964_v1, %v962_v0  ;;  %v859_v4 = vpop.f32.mrb[24].mxu1  ;;  %v965_v7 = vsel %vm901_vm10, %v856_v61, %v933_v63 }
 0x224   : > { %v860_v8 = vadd.f32 %v859_v4, %v683_v2  ;;  %v861_v9 = vpop.f32.mrb[25].mxu1  ;;  %v1001_v10 = vpack.c.bf16 %v965_v7, %v963_v6 }
 0x225   : > { %v862_v12 = vadd.f32 %v861_v9, %v683_v2  ;;  %v863_v13 = vpop.f32.mrb[26].mxu1  ;;  %v1035_v57 = vpop.permute.xlu0 %1034 }
 0x226   : > { %v934_v14 = vmul.f32 0.01, %v860_v8  ;;  %v864_v15 = vadd.f32 %v863_v13, %v688_v11  ;;  %v865_v16 = vpop.f32.mrb[27].mxu1  ;;  %1160 = vmatprep.subr.bf16.mxu0 %v1001_v10  ;;  %1550 = vmatprep.subr.bf16.mxu1 %v1001_v10  ;;  %vm902_vm11 = vcmp.gt.f32.partialorder %v860_v8, 0.0  ;;  %v2014_v60 = vpop.permute.xlu1 %1049  ;;  %v1277_v10 = vld [vmem:[#allocation2 + $0x70] sm:$0xff] }
 0x227   : > { %v935_v17 = vmul.f32 0.01, %v862_v12  ;;  %v866_v18 = vadd.f32 %v865_v16, %v688_v11  ;;  %1161 = vmatpush1.bf16.msra.mxu0 %v1000_v3  ;;  %1558 = vmatpush1.bf16.msra.mxu1 %v1000_v3  ;;  %vm903_vm12 = vcmp.gt.f32.partialorder %v862_v12, 0.0 }
 0x228   : > { %vm904_vm13 = vcmp.gt.f32.partialorder %v864_v15, 0.0  ;;  %v936_v19 = vmul.f32 0.01, %v864_v15  ;;  %v966_v21 = vsel %vm902_vm11, %v860_v8, %v934_v14  ;;  %v1263_v8 = vld [vmem:[#allocation2] sm:$0xff] }
 0x229   : > { %vm905_vm14 = vcmp.gt.f32.partialorder %v866_v18, 0.0  ;;  %v937_v20 = vmul.f32 0.01, %v866_v18  ;;  %v967_v26 = vsel %vm903_vm12, %v862_v12, %v935_v17  ;;  %v2012_v59 = vpop.permute.xlu0 %1044 }
 0x22a   : > { %v968_v22 = vsel %vm904_vm13, %v864_v15, %v936_v19  ;;  %v2018_v62 = vpop.permute.xlu1 %1059 }
 0x22b   : > { %v1002_v24 = vpack.c.bf16 %v968_v22, %v966_v21  ;;  %v869_v25 = vpop.f32.mrb[28].mxu1  ;;  %v969_v27 = vsel %vm905_vm14, %v866_v18, %v937_v20  ;;  %v1264_v18 = vld [vmem:[#allocation2 + $0x8] sm:$0xff]  ;;  %v1278_v20 = vld [vmem:[#allocation2 + $0x78] sm:$0xff] }
 0x22c   : > { %v870_v28 = vadd.f32 %v869_v25, %v693_v23  ;;  %v871_v29 = vpop.f32.mrb[29].mxu1  ;;  %v1003_v30 = vpack.c.bf16 %v969_v27, %v967_v26 }
 0x22d   : > { %v872_v32 = vadd.f32 %v871_v29, %v693_v23  ;;  %v873_v33 = vpop.f32.mrb[30].mxu1  ;;  %v2016_v61 = vpop.permute.xlu0 %1054 }
 0x22e   : > { %v938_v34 = vmul.f32 0.01, %v870_v28  ;;  %v874_v35 = vadd.f32 %v873_v33, %v698_v31  ;;  %v875_v36 = vpop.f32.mrb[31].mxu1  ;;  %1162 = vmatprep.subr.bf16.mxu0 %v1003_v30  ;;  %1551 = vmatprep.subr.bf16.mxu1 %v1003_v30  ;;  %vm906_vm15 = vcmp.gt.f32.partialorder %v870_v28, 0.0 }
 0x22f   : > { %v939_v37 = vmul.f32 0.01, %v872_v32  ;;  %v876_v38 = vadd.f32 %v875_v36, %v698_v31  ;;  %1163 = vmatpush1.bf16.msra.mxu0 %v1002_v24  ;;  %1559 = vmatpush1.bf16.msra.mxu1 %v1002_v24  ;;  %vm907_vm0 = vcmp.gt.f32.partialorder %v872_v32, 0.0  ;;  %v1265_v36 = vld [vmem:[#allocation2 + $0x10] sm:$0xff] }
 0x230   : > { %vm908_vm1 = vcmp.gt.f32.partialorder %v874_v35, 0.0  ;;  %v940_v39 = vmul.f32 0.01, %v874_v35  ;;  %v970_v41 = vsel %vm906_vm15, %v870_v28, %v938_v34 }
 0x231   : > { %vm909_vm2 = vcmp.gt.f32.partialorder %v876_v38, 0.0  ;;  %v941_v40 = vmul.f32 0.01, %v876_v38  ;;  %v971_v44 = vsel %vm907_vm0, %v872_v32, %v939_v37  ;;  %v2020_v63 = vpop.permute.xlu0 %1064 }
 0x232   : > { %v972_v42 = vsel %vm908_vm1, %v874_v35, %v940_v39 }
 0x233   : > { %v1004_v43 = vpack.c.bf16 %v972_v42, %v970_v41  ;;  %v973_v45 = vsel %vm909_vm2, %v876_v38, %v941_v40  ;;  %v1266_v41 = vld [vmem:[#allocation2 + $0x18] sm:$0xff] }
 0x234   : > { %v1005_v46 = vpack.c.bf16 %v973_v45, %v971_v44 }
 0x235   : > { %v2024_v0 = vpop.permute.xlu0 %1074 }
 0x236   : > { %1164 = vmatprep.subr.bf16.mxu0 %v1005_v46  ;;  %1552 = vmatprep.subr.bf16.mxu1 %v1005_v46 }
 0x237   : > { %1165 = vmatpush1.bf16.msra.mxu0 %v1004_v43  ;;  %1560 = vmatpush1.bf16.msra.mxu1 %v1004_v43 }
 0x239   : > { %v2028_v2 = vpop.permute.xlu0 %1084 }
 0x23a   : > { %1183 = vmatmul.mubr.bf16.vlgmr.msra.gmra.mrb[16].mxu0 %v1633_v47  ;;  %1253 = vmatmul.mubr.bf16.vlgmr.msra.gmra.mrb[32].mxu1 %v1634_v48 }
 0x23b   : > { %1192 = vmatprep.mubr.bf16.mxu0 %v1698_v5 }
 0x23d   : > { %v1095_v4 = vpop.permute.xlu0 %1094 }
 0x242   : > { %1193 = vmatmul.mubr.bf16.gmra.mrb[20].mxu0 %v1635_v49 }
 0x243   : > { %1202 = vmatprep.mubr.bf16.mxu0 %v1698_v5 }
 0x24a   : > { %1203 = vmatmul.mubr.bf16.gmra.mrb[24].mxu0 %v1636_v50  ;;  %v1267_v50 = vld [vmem:[#allocation2 + $0x20] sm:$0xff] }
 0x24b   : > { %1212 = vmatprep.mubr.bf16.mxu0 %v1698_v5 }
 0x252   : > { %1213 = vmatmul.mubr.bf16.gmra.mrb[28].mxu0 %v1637_v51 }
 0x253   : > { %1222 = vmatprep.mubr.bf16.mxu0 %v1698_v5 }
 0x25a   : > { %1223 = vmatmul.mubr.bf16.gmra.mrb[32].mxu0 %v1638_v52 }
 0x25b   : > { %1232 = vmatprep.mubr.bf16.mxu0 %v1698_v5 }
 0x262   : > { %1233 = vmatmul.mubr.bf16.gmra.mrb[36].mxu0 %v1639_v53 }
 0x263   : > { %1242 = vmatprep.mubr.bf16.mxu0 %v1698_v5  ;;  %v2022_v5 = vpop.permute.xlu1 %1069 }
 0x267   : > { %v2026_v1 = vpop.permute.xlu1 %1079 }
 0x26a   : > { %1243 = vmatmul.mubr.bf16.gmra.mrb[40].mxu0 %v1640_v54 }
 0x26b   : > { %v2030_v3 = vpop.permute.xlu1 %1089 }
 0x26f   : > { %v1100_v6 = vpop.permute.xlu1 %1099 }
 0x30d   : > { %v1184_v7 = vpop.f32.mrb[16].mxu0  ;;  %v1254_v9 = vpop.f32.mrb[32].mxu1 }
 0x30e   : > { %v1185_v11 = vadd.f32 %v1184_v7, %v1025_v55  ;;  %v1255_v12 = vadd.f32 %v1254_v9, %v1095_v4  ;;  %v1186_v13 = vpop.f32.mrb[17].mxu0  ;;  %v1256_v14 = vpop.f32.mrb[33].mxu1 }
 0x30f   : > { %v1187_v15 = vadd.f32 %v1186_v13, %v1025_v55  ;;  %v1257_v16 = vadd.f32 %v1256_v14, %v1095_v4  ;;  %v1188_v17 = vpop.f32.mrb[18].mxu0  ;;  %v1258_v19 = vpop.f32.mrb[34].mxu1  ;;  %v1268_v55 = vld [vmem:[#allocation2 + $0x28] sm:$0xff]  ;;  %v1270_v14 = vld [vmem:[#allocation2 + $0x38] sm:$0xff] }
 0x310   : > { %v1279_v21 = vmax.f32 %v1263_v8, %v1185_v11  ;;  %v1293_v22 = vmax.f32 %v1277_v10, %v1255_v12  ;;  %v1189_v23 = vadd.f32 %v1188_v17, %v1030_v56  ;;  %v1259_v24 = vadd.f32 %v1258_v19, %v1100_v6  ;;  %v1190_v25 = vpop.f32.mrb[19].mxu0  ;;  %v1260_v26 = vpop.f32.mrb[35].mxu1  ;;  %v1269_v10 = vld [vmem:[#allocation2 + $0x30] sm:$0xff] }
 0x311   : > { %v1191_v27 = vadd.f32 %v1190_v25, %v1030_v56  ;;  %v1261_v28 = vadd.f32 %v1260_v26, %v1100_v6  ;;  %v1272_v26 = vld [vmem:[#allocation2 + $0x48] sm:$0xff] }
 0x312   : > { %v1295_v29 = vmax.f32 %v1279_v21, %v1187_v15  ;;  %v1309_v30 = vmax.f32 %v1293_v22, %v1257_v16  ;;  %v1280_v31 = vmax.f32 %v1264_v18, %v1189_v23  ;;  %v1294_v32 = vmax.f32 %v1278_v20, %v1259_v24  ;;  %v1271_v22 = vld [vmem:[#allocation2 + $0x40] sm:$0xff] }
 0x314   : > { %1311 = vst [vmem:[#allocation2] sm:$0xff] %v1295_v29  ;;  %1325 = vst [vmem:[#allocation2 + $0x70] sm:$0xff] %v1309_v30  ;;  %v1296_v33 = vmax.f32 %v1280_v31, %v1191_v27  ;;  %v1310_v34 = vmax.f32 %v1294_v32, %v1261_v28 }
 0x315   : > { %v1194_v35 = vpop.f32.mrb[20].mxu0 }
 0x316   : > { %1312 = vst [vmem:[#allocation2 + $0x8] sm:$0xff] %v1296_v33  ;;  %1326 = vst [vmem:[#allocation2 + $0x78] sm:$0xff] %v1310_v34  ;;  %v1195_v37 = vadd.f32 %v1194_v35, %v1035_v57  ;;  %v1196_v38 = vpop.f32.mrb[21].mxu0  ;;  %v1273_v34 = vld [vmem:[#allocation2 + $0x50] sm:$0xff] }
 0x317   : > { %v1197_v39 = vadd.f32 %v1196_v38, %v1035_v57  ;;  %v1198_v40 = vpop.f32.mrb[22].mxu0  ;;  %v1274_v38 = vld [vmem:[#allocation2 + $0x58] sm:$0xff] }
 0x318   : > { %v1281_v42 = vmax.f32 %v1265_v36, %v1195_v37  ;;  %v1199_v43 = vadd.f32 %v1198_v40, %v1040_v58  ;;  %v1200_v44 = vpop.f32.mrb[23].mxu0 }
 0x319   : > { %v1201_v45 = vadd.f32 %v1200_v44, %v1040_v58 }
 0x31a   : > { %v1297_v46 = vmax.f32 %v1281_v42, %v1197_v39  ;;  %v1282_v47 = vmax.f32 %v1266_v41, %v1199_v43 }
 0x31c   : > { %1313 = vst [vmem:[#allocation2 + $0x10] sm:$0xff] %v1297_v46  ;;  %v1298_v48 = vmax.f32 %v1282_v47, %v1201_v45  ;;  %v1275_v46 = vld [vmem:[#allocation2 + $0x60] sm:$0xff] }
 0x31d   : > { %v1204_v49 = vpop.f32.mrb[24].mxu0 }
 0x31e   : > { %1314 = vst [vmem:[#allocation2 + $0x18] sm:$0xff] %v1298_v48  ;;  %v1205_v51 = vadd.f32 %v1204_v49, %v2012_v59  ;;  %v1206_v52 = vpop.f32.mrb[25].mxu0 }
 0x31f   : > { %v1207_v53 = vadd.f32 %v1206_v52, %v2012_v59  ;;  %v1208_v54 = vpop.f32.mrb[26].mxu0 }
 0x320   : > { %v1283_v56 = vmax.f32 %v1267_v50, %v1205_v51  ;;  %v1209_v57 = vadd.f32 %v1208_v54, %v2014_v60  ;;  %v1210_v4 = vpop.f32.mrb[27].mxu0  ;;  %v1276_v50 = vld [vmem:[#allocation2 + $0x68] sm:$0xff] }
 0x321   : > { %v1211_v58 = vadd.f32 %v1210_v4, %v2014_v60  ;;  %v1331_v4 = vld [vmem:[#allocation2] sm:$0xff] (!%p1542_p10) }
 0x322   : > { %v1299_v6 = vmax.f32 %v1283_v56, %v1207_v53  ;;  %v1284_v7 = vmax.f32 %v1268_v55, %v1209_v57  ;;  %1347 = vmax.xlane.f32.xlu0 (!%p1542_p10), %v1331_v4 }
 0x323   : > { %v1333_v57 = vld [vmem:[#allocation2 + $0x10] sm:$0xff] (!%p1542_p10) }
 0x324   : > { %1315 = vst [vmem:[#allocation2 + $0x20] sm:$0xff] %v1299_v6  ;;  %v1300_v8 = vmax.f32 %v1284_v7, %v1211_v58  ;;  %1351 = vmax.xlane.f32.xlu1 (!%p1542_p10), %v1333_v57  ;;  %v1332_v58 = vld [vmem:[#allocation2 + $0x8] sm:$0xff] (!%p1542_p10) }
 0x325   : > { %v1214_v9 = vpop.f32.mrb[28].mxu0 }
 0x326   : > { %1316 = vst [vmem:[#allocation2 + $0x28] sm:$0xff] %v1300_v8  ;;  %v1215_v11 = vadd.f32 %v1214_v9, %v2016_v61  ;;  %v1216_v12 = vpop.f32.mrb[29].mxu0  ;;  %1349 = vmax.xlane.f32.xlu0 (!%p1542_p10), %v1332_v58 }
 0x327   : > { %v1217_v59 = vadd.f32 %v1216_v12, %v2016_v61  ;;  %v1218_v13 = vpop.f32.mrb[30].mxu0 }
 0x328   : > { %v1285_v15 = vmax.f32 %v1269_v10, %v1215_v11  ;;  %v1219_v16 = vadd.f32 %v1218_v13, %v2018_v62  ;;  %v1220_v17 = vpop.f32.mrb[31].mxu0 }
 0x329   : > { %v1221_v60 = vadd.f32 %v1220_v17, %v2018_v62 }
 0x32a   : > { %v1301_v18 = vmax.f32 %v1285_v15, %v1217_v59  ;;  %v1286_v19 = vmax.f32 %v1270_v14, %v1219_v16  ;;  %v1346_v14 = vld [vmem:[#allocation2 + $0x78] sm:$0xff] (!%p1542_p10)  ;;  %v1345_v15 = vld [vmem:[#allocation2 + $0x70] sm:$0xff] (!%p1542_p10) }
 0x32b   : > { %v1335_v7 = vld [vmem:[#allocation2 + $0x20] sm:$0xff] (!%p1542_p10) }
 0x32c   : > { %1317 = vst [vmem:[#allocation2 + $0x30] sm:$0xff] %v1301_v18  ;;  %v1302_v20 = vmax.f32 %v1286_v19, %v1221_v60  ;;  %1355 = vmax.xlane.f32.xlu0 (!%p1542_p10), %v1335_v7 }
 0x32d   : > { %v1224_v21 = vpop.f32.mrb[32].mxu0  ;;  %v1336_v6 = vld [vmem:[#allocation2 + $0x28] sm:$0xff] (!%p1542_p10) }
 0x32e   : > { %1318 = vst [vmem:[#allocation2 + $0x38] sm:$0xff] %v1302_v20  ;;  %v1225_v23 = vadd.f32 %v1224_v21, %v2020_v63  ;;  %v1226_v24 = vpop.f32.mrb[33].mxu0 }
 0x32f   : > { %v1227_v61 = vadd.f32 %v1226_v24, %v2020_v63  ;;  %v1228_v25 = vpop.f32.mrb[34].mxu0 }
 0x330   : > { %v1287_v27 = vmax.f32 %v1271_v22, %v1225_v23  ;;  %v1229_v28 = vadd.f32 %v1228_v25, %v2022_v5  ;;  %v1230_v29 = vpop.f32.mrb[35].mxu0 }
 0x331   : > { %v1231_v62 = vadd.f32 %v1230_v29, %v2022_v5 }
 0x332   : > { %v1303_v30 = vmax.f32 %v1287_v27, %v1227_v61  ;;  %v1288_v31 = vmax.f32 %v1272_v26, %v1229_v28 }
 0x333   : > { %v1337_v8 = vld [vmem:[#allocation2 + $0x30] sm:$0xff] (!%p1542_p10) }
 0x334   : > { %1319 = vst [vmem:[#allocation2 + $0x40] sm:$0xff] %v1303_v30  ;;  %v1304_v32 = vmax.f32 %v1288_v31, %v1231_v62  ;;  %1359 = vmax.xlane.f32.xlu0 (!%p1542_p10), %v1337_v8 }
 0x335   : > { %v1234_v33 = vpop.f32.mrb[36].mxu0 }
 0x336   : > { %1320 = vst [vmem:[#allocation2 + $0x48] sm:$0xff] %v1304_v32  ;;  %v1235_v35 = vadd.f32 %v1234_v33, %v2024_v0  ;;  %v1236_v36 = vpop.f32.mrb[37].mxu0 }
 0x337   : > { %v1237_v63 = vadd.f32 %v1236_v36, %v2024_v0  ;;  %v1238_v37 = vpop.f32.mrb[38].mxu0 }
 0x338   : > { %v1289_v39 = vmax.f32 %v1273_v34, %v1235_v35  ;;  %v1239_v40 = vadd.f32 %v1238_v37, %v2026_v1  ;;  %v1240_v41 = vpop.f32.mrb[39].mxu0 }
 0x339   : > { %v1241_v5 = vadd.f32 %v1240_v41, %v2026_v1 }
 0x33a   : > { %v1305_v42 = vmax.f32 %v1289_v39, %v1237_v63  ;;  %v1290_v43 = vmax.f32 %v1274_v38, %v1239_v40 }
 0x33b   : > { %v1339_v10 = vld [vmem:[#allocation2 + $0x40] sm:$0xff] (!%p1542_p10) }
 0x33c   : > { %1321 = vst [vmem:[#allocation2 + $0x50] sm:$0xff] %v1305_v42  ;;  %v1306_v44 = vmax.f32 %v1290_v43, %v1241_v5  ;;  %1363 = vmax.xlane.f32.xlu0 (!%p1542_p10), %v1339_v10 }
 0x33d   : > { %v1244_v45 = vpop.f32.mrb[40].mxu0  ;;  %v1340_v9 = vld [vmem:[#allocation2 + $0x48] sm:$0xff] (!%p1542_p10) }
 0x33e   : > { %1322 = vst [vmem:[#allocation2 + $0x58] sm:$0xff] %v1306_v44  ;;  %v1245_v47 = vadd.f32 %v1244_v45, %v2028_v2  ;;  %v1246_v48 = vpop.f32.mrb[41].mxu0 }
 0x33f   : > { %v1247_v0 = vadd.f32 %v1246_v48, %v2028_v2  ;;  %v1248_v49 = vpop.f32.mrb[42].mxu0  ;;  %v1334_v2 = vld [vmem:[#allocation2 + $0x18] sm:$0xff] (!%p1542_p10) }
 0x340   : > { %v1291_v51 = vmax.f32 %v1275_v46, %v1245_v47  ;;  %v1249_v52 = vadd.f32 %v1248_v49, %v2030_v3  ;;  %v1250_v53 = vpop.f32.mrb[43].mxu0  ;;  %1330 = sbr.rel (%p1542_p10) target bundleno = 999 (0x3e7), region = 56  ;;  %1353 = vmax.xlane.f32.xlu1 (!%p1542_p10), %v1334_v2 }
 0x341   : > { %v1251_v1 = vadd.f32 %v1250_v53, %v2030_v3  ;;  %v1338_v3 = vld [vmem:[#allocation2 + $0x38] sm:$0xff] (!%p1542_p10) }
 0x342   : > { %v1307_v54 = vmax.f32 %v1291_v51, %v1247_v0  ;;  %v1292_v55 = vmax.f32 %v1276_v50, %v1249_v52 }
 0x343   : > { %v1341_v12 = vld [vmem:[#allocation2 + $0x50] sm:$0xff] (!%p1542_p10) }
 0x344   : > { %1323 = vst [vmem:[#allocation2 + $0x60] sm:$0xff] %v1307_v54  ;;  %v1308_v56 = vmax.f32 %v1292_v55, %v1251_v1  ;;  %1357 = vmax.xlane.f32.xlu1 (!%p1542_p10), %v1336_v6  ;;  %1367 = vmax.xlane.f32.xlu0 (!%p1542_p10), %v1341_v12 }
 0x345   : > { %v1342_v11 = vld [vmem:[#allocation2 + $0x58] sm:$0xff] (!%p1542_p10) }
 0x346   : > { %1324 = vst [vmem:[#allocation2 + $0x68] sm:$0xff] %v1308_v56 }
 0x348   : > { %1361 = vmax.xlane.f32.xlu1 %v1338_v3 }
 0x34b   : > { %v1343_v13 = vld [vmem:[#allocation2 + $0x60] sm:$0xff] }
 0x34c   : > { %1365 = vmax.xlane.f32.xlu1 %v1340_v9  ;;  %1371 = vmax.xlane.f32.xlu0 %v1343_v13 }
 0x34d   : > { %v1344_v59 = vld [vmem:[#allocation2 + $0x68] sm:$0xff] }
 0x350   : > { %1369 = vmax.xlane.f32.xlu1 %v1342_v11  ;;  %1375 = vmax.xlane.f32.xlu0 %v1345_v15 }
 0x354   : > { %1373 = vmax.xlane.f32.xlu1 %v1344_v59 }
 0x358   : > { %1377 = vmax.xlane.f32.xlu1 %v1346_v14 }
 0x3af   : > { %v1348_v17 = vpop.xlane.xlu0 %1347 }
 0x3b0   : > { %1380 = vst.msk [vmem:[%s1795_s11] sm:$0xff] %vm1379_vm3, %v1348_v17 }
 0x3b1   : > { %v1352_v16 = vpop.xlane.xlu1 %1351 }
 0x3b2   : > { %1382 = vst.msk [vmem:[%s1795_s11 + $0x10] sm:$0xff] %vm1379_vm3, %v1352_v16 }
 0x3b3   : > { %v1350_v18 = vpop.xlane.xlu0 %1349 }
 0x3b4   : > { %1381 = vst.msk [vmem:[%s1795_s11 + $0x8] sm:$0xff] %vm1379_vm3, %v1350_v18 }
 0x3b9   : > { %v1356_v20 = vpop.xlane.xlu0 %1355 }
 0x3ba   : > { %1384 = vst.msk [vmem:[%s1795_s11 + $0x20] sm:$0xff] %vm1379_vm3, %v1356_v20 }
 0x3c1   : > { %v1360_v22 = vpop.xlane.xlu0 %1359 }
 0x3c2   : > { %1386 = vst.msk [vmem:[%s1795_s11 + $0x30] sm:$0xff] %vm1379_vm3, %v1360_v22 }
 0x3c9   : > { %v1364_v24 = vpop.xlane.xlu0 %1363 }
 0x3ca   : > { %1388 = vst.msk [vmem:[%s1795_s11 + $0x40] sm:$0xff] %vm1379_vm3, %v1364_v24 }
 0x3cd   : > { %v1354_v60 = vpop.xlane.xlu1 %1353 }
 0x3ce   : > { %1383 = vst.msk [vmem:[%s1795_s11 + $0x18] sm:$0xff] %vm1379_vm3, %v1354_v60 }
 0x3d1   : > { %v1358_v19 = vpop.xlane.xlu1 %1357  ;;  %v1368_v25 = vpop.xlane.xlu0 %1367 }
 0x3d2   : > { %1385 = vst.msk [vmem:[%s1795_s11 + $0x28] sm:$0xff] %vm1379_vm3, %v1358_v19  ;;  %1390 = vst.msk [vmem:[%s1795_s11 + $0x50] sm:$0xff] %vm1379_vm3, %v1368_v25 }
 0x3d5   : > { %v1362_v21 = vpop.xlane.xlu1 %1361 }
 0x3d6   : > { %1387 = vst.msk [vmem:[%s1795_s11 + $0x38] sm:$0xff] %vm1379_vm3, %v1362_v21 }
 0x3d9   : > { %v1366_v23 = vpop.xlane.xlu1 %1365  ;;  %v1372_v27 = vpop.xlane.xlu0 %1371 }
 0x3da   : > { %1389 = vst.msk [vmem:[%s1795_s11 + $0x48] sm:$0xff] %vm1379_vm3, %v1366_v23  ;;  %1392 = vst.msk [vmem:[%s1795_s11 + $0x60] sm:$0xff] %vm1379_vm3, %v1372_v27 }
 0x3dd   : > { %v1370_v61 = vpop.xlane.xlu1 %1369  ;;  %v1376_v29 = vpop.xlane.xlu0 %1375 }
 0x3de   : > { %1391 = vst.msk [vmem:[%s1795_s11 + $0x58] sm:$0xff] %vm1379_vm3, %v1370_v61  ;;  %1394 = vst.msk [vmem:[%s1795_s11 + $0x70] sm:$0xff] %vm1379_vm3, %v1376_v29 }
 0x3e1   : > { %v1374_v26 = vpop.xlane.xlu1 %1373 }
 0x3e2   : > { %1393 = vst.msk [vmem:[%s1795_s11 + $0x68] sm:$0xff] %vm1379_vm3, %v1374_v26 }
 0x3e5   : > { %v1378_v28 = vpop.xlane.xlu1 %1377 }
 0x3e6   : > { %1395 = vst.msk [vmem:[%s1795_s11 + $0x78] sm:$0xff] %vm1379_vm3, %v1378_v28 }
 0x3e7 PF: > { %s17_s30 = sadd.s32 1, %s1695_s30   ;;  %s2116_s16 = sld [smem:[#allocation3_spill]] }
 0x3e8   : > { %p14_p11 = scmp.ge.s32.totalorder %s17_s30, 10   ;;  %s2117_s17 = sld [smem:[#allocation4_spill]] }
 0x3e9   : > { %s2118_s24 = smov %s1683_s27  ;;  %s2119_s25 = smov %s1687_s28 }
 0x3ea   : > { %s2120_s26 = smov %s1691_s29  ;;  %s2121_s27 = smov %s2125_s8 }
 0x3eb   :  { %16 = sbr.rel (!%p14_p11) target bundleno = 4 (0x4), region = 86 }
 0x3ed   : > { %s2122_s28 = smov %s2116_s16 }
 0x3ee   : > { %s2123_s29 = smov %s2117_s17 }

</bundles_post_ra>
